<compile_context>
chip_gen: v6e
topology: v6e:2x2x1
jax: 0.10.0
libtpu: 0.0.40
codegen_flags: <defaults>
</compile_context>

<pallas_src>
import functools

import jax
import jax.numpy as jnp
from jax.experimental import pallas as pl
from jax.experimental.pallas import tpu as pltpu


def _round_up(x, m):
    return ((x + m - 1) // m) * m


def gru_update_kernel(fh_ref, wg_ref, whh_ref, o_ref, *, mxu_dtype):
    d = o_ref.shape[-1]               # d_pad (multiple of 128)
    f_seg = fh_ref.shape[-1] - d      # 128-aligned start of the H segment

    fh = fh_ref[...]                  # (tm, k_pad), activation dtype
    fh_mxu = fh.astype(mxu_dtype)

    # One fused MXU pass: [F | 1 | H] @ [[Wz_f Wr_f Wh_f],[bz br bh],[Wz_h Wr_h 0]]
    gates = jnp.dot(fh_mxu, wg_ref[...], preferred_element_type=jnp.float32)

    # sigmoid(x) == 0.5*tanh(0.5*x)+0.5 : one EUP op per element.
    z = 0.5 * jnp.tanh(0.5 * gates[:, :d]) + 0.5
    r = 0.5 * jnp.tanh(0.5 * gates[:, d:2 * d]) + 0.5

    h32 = fh[:, f_seg:].astype(jnp.float32)     # H_prev, full input precision
    rh = (r * h32).astype(mxu_dtype)            # MXU-dtype operand for Whh
    h_tilde = jnp.tanh(
        gates[:, 2 * d:]
        + jnp.dot(rh, whh_ref[...], preferred_element_type=jnp.float32))

    # Z*H + (1-Z)*H~  ==  H~ + Z*(H - H~)
    o_ref[...] = (h_tilde + z * (h32 - h_tilde)).astype(o_ref.dtype)


def pack_params(raw_params, dim_in, dim_out, mxu_dtype=jnp.bfloat16):
    """Fuse, bias-fold and lane-pad the raw per-gate weights.

    raw_params = (wz, bz, wr, br, wh, bh) with w*: (dim_in+dim_out, dim_out)
    (transpose of nn.Linear.weight) and b*: (dim_out,).
    Returns (wg, whh):
      wg  : (k_pad, 3*d_pad)  rows = [Wf ; bias ; Wh(z,r), 0 for h~], cols = [Z|R|H~]
      whh : (d_pad, d_pad)    applied to R*H only
    """
    wz, bz, wr, br, wh, bh = raw_params
    f_seg = _round_up(dim_in + 1, 128)          # F columns + the bias "1" column
    d_pad = _round_up(dim_out, 128)
    k_pad = f_seg + d_pad

    wg = jnp.zeros((k_pad, 3 * d_pad), jnp.float32)
    for g, (w, b) in enumerate(((wz, bz), (wr, br), (wh, bh))):
        c = g * d_pad
        wg = wg.at[:dim_in, c:c + dim_out].set(w[:dim_in])      # F half
        wg = wg.at[dim_in, c:c + dim_out].set(b)                # bias row
        if g < 2:                                               # H half (Z, R only)
            wg = wg.at[f_seg:f_seg + dim_out, c:c + dim_out].set(w[dim_in:])

    whh = jnp.zeros((d_pad, d_pad), jnp.float32)
    whh = whh.at[:dim_out, :dim_out].set(wh[dim_in:])
    return wg.astype(mxu_dtype), whh.astype(mxu_dtype)


@functools.partial(jax.jit, static_argnames=("tm",))
def gru_updater(H_prev, node_feature, packed_params, *, tm=512):
    """H_prev: (N, dim_out), node_feature: (N, dim_in) -> (N, dim_out)."""
    N, dim_out = H_prev.shape
    _, dim_in = node_feature.shape
    wg, whh = packed_params
    mxu_dtype = wg.dtype
    k_pad, threed = wg.shape
    d_pad = threed // 3
    f_seg = k_pad - d_pad
    act_dtype = H_prev.dtype
    b_act = jnp.dtype(act_dtype).itemsize
    b_mxu = jnp.dtype(mxu_dtype).itemsize

    # ---- row tile: as large as possible; even step count when multi-step ----
    if N <= tm:
        tm_eff = _round_up(max(N, 8), 8)
    else:
        steps = -(-N // tm)
        if steps % 2:            # keep both v7x TensorCores balanced
            steps += 1
        tm_eff = _round_up(-(-N // steps), 8)

    # ---- explicit VMEM budget (v7x: 64 MiB physical, 32 MiB default scoped) ----
    weight_bytes = (k_pad * 3 * d_pad + d_pad * d_pad) * b_mxu  # single-buffered
    def footprint(t):
        act = 2 * t * k_pad * b_act          # fh, double-buffered
        out = 2 * t * d_pad * b_act          # output, double-buffered
        scratch = t * 8 * d_pad * 4          # f32 gates / temporaries
        return act + out + scratch + weight_bytes
    budget = 24 * 1024 * 1024
    while tm_eff > 8 and footprint(tm_eff) > budget:
        tm_eff = max(8, _round_up(tm_eff // 2, 8))
    # TODO(synk): for very large dim_out (weights alone > budget) add an
    # 'arbitrary' grid axis over gate columns instead of shrinking tm.
    vmem_limit = int(min(max(32 * 2**20, 1.25 * footprint(tm_eff)), 100 * 2**20))

    n_pad = _round_up(N, tm_eff)

    # ---- build the fused [F | 1 | H] activation buffer ----
    fh = jnp.zeros((n_pad, k_pad), act_dtype)
    fh = fh.at[:N, :dim_in].set(node_feature.astype(act_dtype))
    fh = fh.at[:N, dim_in].set(jnp.asarray(1.0, act_dtype))     # bias column
    fh = fh.at[:N, f_seg:f_seg + dim_out].set(H_prev)

    out = pl.pallas_call(
        functools.partial(gru_update_kernel, mxu_dtype=mxu_dtype),
        out_shape=jax.ShapeDtypeStruct((n_pad, d_pad), act_dtype),
        grid=(n_pad // tm_eff,),
        in_specs=[
            pl.BlockSpec((tm_eff, k_pad), lambda i: (i, 0)),            # [F|1|H] rows
            pl.BlockSpec(memory_space=pltpu.MemorySpace.VMEM),          # fused gate W (+bias)
            pl.BlockSpec(memory_space=pltpu.MemorySpace.VMEM),          # Whh
        ],
        out_specs=pl.BlockSpec((tm_eff, d_pad), lambda i: (i, 0)),
        compiler_params=pltpu.CompilerParams(
            dimension_semantics=("parallel",),
            vmem_limit_bytes=vmem_limit),
    )(fh, wg, whh)

    if n_pad == N and d_pad == dim_out:
        return out                       # aligned case: zero wrapper copies
    return out[:N, :dim_out]


def init_params(key, dim_in, dim_out):
    """Deterministic init mimicking nn.Linear(dim_in+dim_out, dim_out)."""
    fan_in = dim_in + dim_out
    bound = 1.0 / jnp.sqrt(fan_in)
    keys = jax.random.split(key, 6)

    def lin(kw, kb):
        w = jax.random.uniform(kw, (fan_in, dim_out), jnp.float32, -bound, bound)
        b = jax.random.uniform(kb, (dim_out,), jnp.float32, -bound, bound)
        return w, b

    wz, bz = lin(keys[0], keys[1])
    wr, br = lin(keys[2], keys[3])
    wh, bh = lin(keys[4], keys[5])
    return (wz, bz, wr, br, wh, bh)


def gru_updater_ref(H_prev, node_feature, raw_params):
    """Pure-JAX reference matching the PyTorch forward."""
    wz, bz, wr, br, wh, bh = raw_params
    dim_in = node_feature.shape[1]
    z = jax.nn.sigmoid(node_feature @ wz[:dim_in] + H_prev @ wz[dim_in:] + bz)
    r = jax.nn.sigmoid(node_feature @ wr[:dim_in] + H_prev @ wr[dim_in:] + br)
    h_tilde = jnp.tanh(node_feature @ wh[:dim_in] + (r * H_prev) @ wh[dim_in:] + bh)
    return z * H_prev + (1.0 - z) * h_tilde


if __name__ == "__main__":
    dim_in, dim_out = 32, 32
    key = jax.random.PRNGKey(0)
    k_p, k_h, k_f = jax.random.split(key, 3)

    raw_params = init_params(k_p, dim_in, dim_out)
    packed_f32 = pack_params(raw_params, dim_in, dim_out, mxu_dtype=jnp.float32)
    packed_bf16 = pack_params(raw_params, dim_in, dim_out, mxu_dtype=jnp.bfloat16)

    # 1) small N, f32 MXU path — bit-tight vs reference.
    N = 16
    H_prev = jax.random.normal(k_h, (N, dim_out), jnp.float32)
    node_feature = jax.random.normal(k_f, (N, dim_in), jnp.float32)
    ref = gru_updater_ref(H_prev, node_feature, raw_params)

    out = jax.block_until_ready(gru_updater(H_prev, node_feature, packed_f32))
    assert out.shape == (N, dim_out)
    assert jnp.allclose(out, ref, atol=1e-4, rtol=1e-4), \
        f"f32 path: max abs err {jnp.max(jnp.abs(out - ref))}"

    # 2) same inputs, bf16 MXU path (perf default) — looser tolerance.
    out_bf = jax.block_until_ready(gru_updater(H_prev, node_feature, packed_bf16))
    assert jnp.allclose(out_bf, ref, atol=6e-2, rtol=6e-2), \
        f"bf16 path: max abs err {jnp.max(jnp.abs(out_bf - ref))}"

    # 3) multi-step grid + ragged rows (small tm forces >1 grid step).
    N2 = 200
    H2 = jax.random.normal(jax.random.PRNGKey(1), (N2, dim_out), jnp.float32)
    F2 = jax.random.normal(jax.random.PRNGKey(2), (N2, dim_in), jnp.float32)
    ref2 = gru_updater_ref(H2, F2, raw_params)
    out2 = jax.block_until_ready(gru_updater(H2, F2, packed_f32, tm=64))
    assert out2.shape == (N2, dim_out)
    assert jnp.allclose(out2, ref2, atol=1e-4, rtol=1e-4), \
        f"multi-tile path: max abs err {jnp.max(jnp.abs(out2 - ref2))}"

    print("KERNEL_OK")
</pallas_src>

<mosaic_0001>
module attributes {stable_mosaic.version = 11 : i64} {
  func.func @gru_update_kernel(%arg0: i32, %arg1: memref<16x256xf32, #tpu.memory_space<vmem>>, %arg2: memref<256x384xf32, #tpu.memory_space<vmem>>, %arg3: memref<128x128xf32, #tpu.memory_space<vmem>>, %arg4: memref<16x128xf32, #tpu.memory_space<vmem>>) attributes {dimension_semantics = [#tpu.dimension_semantics<parallel>], iteration_bounds = array<i64: 1>, scalar_prefetch = 0 : i64, scratch_operands = 0 : i64, tpu.core_type = #tpu.core_type<tc>, window_params = [{transform_indices = @transform_0, window_bounds = array<i64: 16, 256>}, {pipeline_mode = #tpu.pipeline_mode<synchronous>, transform_indices = @transform_1, window_bounds = array<i64: 256, 384>}, {pipeline_mode = #tpu.pipeline_mode<synchronous>, transform_indices = @transform_2, window_bounds = array<i64: 128, 128>}, {transform_indices = @transform_3, window_bounds = array<i64: 16, 128>}]} {
    %c0 = arith.constant 0 : index
    %c0_0 = arith.constant 0 : index
    %0 = vector.load %arg1[%c0, %c0_0] : memref<16x256xf32, #tpu.memory_space<vmem>>, vector<16x256xf32>
    %c0_1 = arith.constant 0 : index
    %c0_2 = arith.constant 0 : index
    %1 = vector.load %arg2[%c0_1, %c0_2] : memref<256x384xf32, #tpu.memory_space<vmem>>, vector<256x384xf32>
    %cst = arith.constant dense<0.000000e+00> : vector<16x384xf32>
    %2 = tpu.matmul %0, %1, %cst {dimension_numbers = #tpu.dot_dimension_numbers<[1], [0], [0], [1], [0, 0, 1, 1], [], []>} : vector<16x256xf32>, vector<256x384xf32>, vector<16x384xf32> -> vector<16x384xf32>
    %3 = vector.extract_strided_slice %2 {offsets = [0, 0], sizes = [16, 128], strides = [1, 1]} : vector<16x384xf32> to vector<16x128xf32>
    %cst_3 = arith.constant 5.000000e-01 : f32
    %4 = vector.broadcast %cst_3 : f32 to vector<16x128xf32>
    %5 = arith.mulf %4, %3 : vector<16x128xf32>
    %6 = math.tanh %5 : vector<16x128xf32>
    %cst_4 = arith.constant 5.000000e-01 : f32
    %7 = vector.broadcast %cst_4 : f32 to vector<16x128xf32>
    %8 = arith.mulf %7, %6 : vector<16x128xf32>
    %cst_5 = arith.constant 5.000000e-01 : f32
    %9 = vector.broadcast %cst_5 : f32 to vector<16x128xf32>
    %10 = arith.addf %8, %9 : vector<16x128xf32>
    %11 = vector.extract_strided_slice %2 {offsets = [0, 128], sizes = [16, 128], strides = [1, 1]} : vector<16x384xf32> to vector<16x128xf32>
    %cst_6 = arith.constant 5.000000e-01 : f32
    %12 = vector.broadcast %cst_6 : f32 to vector<16x128xf32>
    %13 = arith.mulf %12, %11 : vector<16x128xf32>
    %14 = math.tanh %13 : vector<16x128xf32>
    %cst_7 = arith.constant 5.000000e-01 : f32
    %15 = vector.broadcast %cst_7 : f32 to vector<16x128xf32>
    %16 = arith.mulf %15, %14 : vector<16x128xf32>
    %cst_8 = arith.constant 5.000000e-01 : f32
    %17 = vector.broadcast %cst_8 : f32 to vector<16x128xf32>
    %18 = arith.addf %16, %17 : vector<16x128xf32>
    %19 = vector.extract_strided_slice %0 {offsets = [0, 128], sizes = [16, 128], strides = [1, 1]} : vector<16x256xf32> to vector<16x128xf32>
    %20 = arith.mulf %18, %19 : vector<16x128xf32>
    %21 = vector.extract_strided_slice %2 {offsets = [0, 256], sizes = [16, 128], strides = [1, 1]} : vector<16x384xf32> to vector<16x128xf32>
    %c0_9 = arith.constant 0 : index
    %c0_10 = arith.constant 0 : index
    %22 = vector.load %arg3[%c0_9, %c0_10] : memref<128x128xf32, #tpu.memory_space<vmem>>, vector<128x128xf32>
    %cst_11 = arith.constant dense<0.000000e+00> : vector<16x128xf32>
    %23 = tpu.matmul %20, %22, %cst_11 {dimension_numbers = #tpu.dot_dimension_numbers<[1], [0], [0], [1], [0, 0, 1, 1], [], []>} : vector<16x128xf32>, vector<128x128xf32>, vector<16x128xf32> -> vector<16x128xf32>
    %24 = arith.addf %21, %23 : vector<16x128xf32>
    %25 = math.tanh %24 : vector<16x128xf32>
    %26 = arith.subf %19, %25 : vector<16x128xf32>
    %27 = arith.mulf %10, %26 : vector<16x128xf32>
    %28 = arith.addf %25, %27 : vector<16x128xf32>
    %c0_12 = arith.constant 0 : index
    %c0_13 = arith.constant 0 : index
    %29 = vector.load %arg4[%c0_12, %c0_13] : memref<16x128xf32, #tpu.memory_space<vmem>>, vector<16x128xf32>
    tpu.vector_store %arg4[%c0_12, %c0_13], %28 {strides = array<i32>} : memref<16x128xf32, #tpu.memory_space<vmem>>, vector<16x128xf32>,
    return
  }
  func.func @transform_0(%arg0: i32) -> (i32, i32) {
    %c0_i32 = arith.constant 0 : i32
    %c0_i32_0 = arith.constant 0 : i32
    return %arg0, %c0_i32 : i32, i32
  }
  func.func @transform_1(%arg0: i32) -> (i32, i32) {
    %c0_i32 = arith.constant 0 : i32
    %c0_i32_0 = arith.constant 0 : i32
    %c0_i32_1 = arith.constant 0 : i32
    return %c0_i32, %c0_i32_0 : i32, i32
  }
  func.func @transform_2(%arg0: i32) -> (i32, i32) {
    %c0_i32 = arith.constant 0 : i32
    %c0_i32_0 = arith.constant 0 : i32
    %c0_i32_1 = arith.constant 0 : i32
    return %c0_i32, %c0_i32_0 : i32, i32
  }
  func.func @transform_3(%arg0: i32) -> (i32, i32) {
    %c0_i32 = arith.constant 0 : i32
    %c0_i32_0 = arith.constant 0 : i32
    return %arg0, %c0_i32 : i32, i32
  }
}

</mosaic_0001>

<bundles_post_ra>
// kernel: gru_updater.1
= control target key start
LH: loop header
LB: loop body
LE: loop exit
PB: predicated region body
PF: predicated region fallthrough
CT: control target
= control target key end

     0   :  { %8 = vsyncpa [#allocation3], 0  ;;  %s676_s0 = inlined_call_operand.vmem [shape: f32[16,256], index: 0, kind: input, shape index: {}]   ;;  %s677_s1 = inlined_call_operand.hbm [shape: f32[256,384], index: 1, kind: input, shape index: {}]   ;;  %s678_s2 = inlined_call_operand.vmem [shape: f32[128,128], index: 2, kind: input, shape index: {}]   ;;  %s679_s3 = inlined_call_operand.hbm [shape: f32[16,128], index: 3, kind: output, shape index: {}]  }
   0x1   :  { %9 = vsyncpa [#allocation4], 0  ;;  %s572_s12 = smov [#allocation2]  }
   0x2   :  { %s17_s13 = sshll.u32 %s572_s12, 4  ;;  %s18_s13 = int_to_ptr.vmem [resolvable:$true] %s17_s13 }
   0x3   :  { %s536_s14 = scalar_lea.vmem %s18_s13, 12288  ;;  %p541_p1 = scmp.lt.s32.totalorder %s18_s13, %s18_s13 }
   0x4   :  { %p537_p0 = scmp.ne.s32.totalorder %s18_s13, %s536_s14  ;;  %p542_p2 = scmp.lt.s32.totalorder %s536_s14, %s536_s14 }
   0x6   :  { %p543_p3 = por %p542_p2, %p541_p1 }
   0x8   :  { %p544_p4 = pnand %p543_p3, %p537_p0 }
   0xa   :  { %547 = shalt.err (!%p544_p4)
}
   0xb   :  { %s573_s15 = smov 384   ;;  %s574_s16 = smov 24  }
   0xc   :  { %23 = dma.hbm_to_vmem [thread:$0]  %s677_s1, 12288, %s18_s13, [#allocation3], %s573_s15, %s573_s15, %s574_s16  }
   0xd   :  { %568 = dma.done.wait [#allocation3], 12288  }
   0xe   :  { %569 = vsyncadd [#allocation3], 4294955008  ;;  %v79_v0 = vld [vmem:[#allocation2 + $0x170] sm:$0xff]  ;;  %v78_v1 = vld [vmem:[#allocation2 + $0x168] sm:$0xff] }
   0xf   :  { %v76_v2 = vld [vmem:[#allocation2 + $0x158] sm:$0xff]  ;;  %129 = vmatprep.subr.mxu0 %v79_v0  ;;  %v75_v3 = vld [vmem:[#allocation2 + $0x150] sm:$0xff]  ;;  %v73_v4 = vld [vmem:[#allocation2 + $0x140] sm:$0xff] }
  0x10   :  { %130 = vmatpush1.msra.mxu0 %v78_v1  ;;  %v72_v5 = vld [vmem:[#allocation2 + $0x138] sm:$0xff]  ;;  %v70_v6 = vld [vmem:[#allocation2 + $0x128] sm:$0xff]  ;;  %v69_v7 = vld [vmem:[#allocation2 + $0x120] sm:$0xff] }
  0x11   :  { %131 = vmatprep.subr.mxu0 %v76_v2  ;;  %v67_v8 = vld [vmem:[#allocation2 + $0x110] sm:$0xff]  ;;  %v66_v9 = vld [vmem:[#allocation2 + $0x108] sm:$0xff]  ;;  %v64_v10 = vld [vmem:[#allocation2 + $0xf8] sm:$0xff] }
  0x12   :  { %132 = vmatpush1.msra.mxu0 %v75_v3  ;;  %v63_v11 = vld [vmem:[#allocation2 + $0xf0] sm:$0xff]  ;;  %v61_v12 = vld [vmem:[#allocation2 + $0xe0] sm:$0xff]  ;;  %v60_v13 = vld [vmem:[#allocation2 + $0xd8] sm:$0xff] }
  0x13   :  { %133 = vmatprep.subr.mxu0 %v73_v4  ;;  %v58_v14 = vld [vmem:[#allocation2 + $0xc8] sm:$0xff]  ;;  %v57_v15 = vld [vmem:[#allocation2 + $0xc0] sm:$0xff]  ;;  %v55_v16 = vld [vmem:[#allocation2 + $0xb0] sm:$0xff] }
  0x14   :  { %134 = vmatpush1.msra.mxu0 %v72_v5  ;;  %v54_v17 = vld [vmem:[#allocation2 + $0xa8] sm:$0xff]  ;;  %v52_v18 = vld [vmem:[#allocation2 + $0x98] sm:$0xff]  ;;  %v51_v19 = vld [vmem:[#allocation2 + $0x90] sm:$0xff] }
  0x15   :  { %135 = vmatprep.subr.mxu0 %v70_v6  ;;  %v49_v20 = vld [vmem:[#allocation2 + $0x80] sm:$0xff]  ;;  %v48_v21 = vld [vmem:[#allocation2 + $0x78] sm:$0xff]  ;;  %v46_v22 = vld [vmem:[#allocation2 + $0x68] sm:$0xff] }
  0x16   :  { %136 = vmatpush1.msra.mxu0 %v69_v7  ;;  %v45_v23 = vld [vmem:[#allocation2 + $0x60] sm:$0xff]  ;;  %v604_v24 = vld [vmem:[%s676_s0 + $0x8] sm:$0xff]  ;;  %v43_v25 = vld [vmem:[#allocation2 + $0x50] sm:$0xff] }
  0x17   :  { %137 = vmatprep.subr.mxu0 %v67_v8  ;;  %v42_v26 = vld [vmem:[#allocation2 + $0x48] sm:$0xff]  ;;  %193 = vmatprep.mubr.f32.mxu0 %v604_v24  ;;  %v128_v27 = vld [vmem:[#allocation2 + $0x2f8] sm:$0xff]  ;;  %v125_v29 = vld [vmem:[#allocation2 + $0x2e0] sm:$0xff] }
  0x18   :  { %138 = vmatpush1.msra.mxu0 %v66_v9  ;;  %419 = vmatprep.subr.mxu1 %v128_v27  ;;  %v80_v28 = vld [vmem:[#allocation2 + $0x178] sm:$0xff]  ;;  %v77_v30 = vld [vmem:[#allocation2 + $0x160] sm:$0xff]  ;;  %v122_v32 = vld [vmem:[#allocation2 + $0x2c8] sm:$0xff] }
  0x19   :  { %139 = vmatprep.subr.mxu0 %v64_v10  ;;  %v40_v31 = vld [vmem:[#allocation2 + $0x38] sm:$0xff]  ;;  %420 = vmatpush3.msra.mxu1 %v80_v28  ;;  %v39_v33 = vld [vmem:[#allocation2 + $0x30] sm:$0xff]  ;;  %v74_v34 = vld [vmem:[#allocation2 + $0x148] sm:$0xff] }
  0x1a   :  { %140 = vmatpush1.msra.mxu0 %v63_v11  ;;  %421 = vmatprep.subr.mxu1 %v125_v29  ;;  %v37_v35 = vld [vmem:[#allocation2 + $0x20] sm:$0xff]  ;;  %v119_v36 = vld [vmem:[#allocation2 + $0x2b0] sm:$0xff]  ;;  %v36_v37 = vld [vmem:[#allocation2 + $0x18] sm:$0xff] }
  0x1b   :  { %141 = vmatprep.subr.mxu0 %v61_v12  ;;  %422 = vmatpush3.msra.mxu1 %v77_v30  ;;  %v71_v38 = vld [vmem:[#allocation2 + $0x130] sm:$0xff]  ;;  %v34_v39 = vld [vmem:[#allocation2 + $0x8] sm:$0xff]  ;;  %v116_v40 = vld [vmem:[#allocation2 + $0x298] sm:$0xff] }
  0x1c   :  { %142 = vmatpush1.msra.mxu0 %v60_v13  ;;  %423 = vmatprep.subr.mxu1 %v122_v32  ;;  %v33_v41 = vld [vmem:[#allocation2] sm:$0xff]  ;;  %v68_v42 = vld [vmem:[#allocation2 + $0x118] sm:$0xff]  ;;  %v127_v43 = vld [vmem:[#allocation2 + $0x2f0] sm:$0xff] }
  0x1d   :  { %143 = vmatprep.subr.mxu0 %v58_v14  ;;  %424 = vmatpush3.msra.mxu1 %v74_v34  ;;  %v113_v44 = vld [vmem:[#allocation2 + $0x280] sm:$0xff]  ;;  %v126_v45 = vld [vmem:[#allocation2 + $0x2e8] sm:$0xff]  ;;  %v124_v47 = vld [vmem:[#allocation2 + $0x2d8] sm:$0xff] }
  0x1e   :  { %144 = vmatpush1.msra.mxu0 %v57_v15  ;;  %425 = vmatprep.subr.mxu1 %v119_v36  ;;  %v65_v46 = vld [vmem:[#allocation2 + $0x100] sm:$0xff]  ;;  %v110_v48 = vld [vmem:[#allocation2 + $0x268] sm:$0xff]  ;;  %v123_v49 = vld [vmem:[#allocation2 + $0x2d0] sm:$0xff] }
  0x1f   :  { %145 = vmatprep.subr.mxu0 %v55_v16  ;;  %426 = vmatpush3.msra.mxu1 %v71_v38  ;;  %v62_v50 = vld [vmem:[#allocation2 + $0xe8] sm:$0xff]  ;;  %v121_v51 = vld [vmem:[#allocation2 + $0x2c0] sm:$0xff]  ;;  %v107_v52 = vld [vmem:[#allocation2 + $0x250] sm:$0xff] }
  0x20   :  { %146 = vmatpush1.msra.mxu0 %v54_v17  ;;  %427 = vmatprep.subr.mxu1 %v116_v40  ;;  %v120_v53 = vld [vmem:[#allocation2 + $0x2b8] sm:$0xff]  ;;  %v59_v54 = vld [vmem:[#allocation2 + $0xd0] sm:$0xff]  ;;  %v118_v55 = vld [vmem:[#allocation2 + $0x2a8] sm:$0xff] }
  0x21   :  { %147 = vmatprep.subr.mxu0 %v52_v18  ;;  %428 = vmatpush3.msra.mxu1 %v68_v42  ;;  %v104_v56 = vld [vmem:[#allocation2 + $0x238] sm:$0xff]  ;;  %v117_v57 = vld [vmem:[#allocation2 + $0x2a0] sm:$0xff]  ;;  %v115_v59 = vld [vmem:[#allocation2 + $0x290] sm:$0xff] }
  0x22   :  { %148 = vmatpush1.msra.mxu0 %v51_v19  ;;  %429 = vmatprep.subr.mxu1 %v113_v44  ;;  %v56_v58 = vld [vmem:[#allocation2 + $0xb8] sm:$0xff]  ;;  %v101_v60 = vld [vmem:[#allocation2 + $0x220] sm:$0xff]  ;;  %v114_v61 = vld [vmem:[#allocation2 + $0x288] sm:$0xff] }
  0x23   :  { %149 = vmatprep.subr.mxu0 %v49_v20  ;;  %430 = vmatpush3.msra.mxu1 %v65_v46  ;;  %v53_v62 = vld [vmem:[#allocation2 + $0xa0] sm:$0xff]  ;;  %v112_v63 = vld [vmem:[#allocation2 + $0x278] sm:$0xff]  ;;  %v98_v0 = vld [vmem:[#allocation2 + $0x208] sm:$0xff] }
  0x24   :  { %150 = vmatpush1.msra.mxu0 %v48_v21  ;;  %431 = vmatprep.subr.mxu1 %v110_v48  ;;  %v111_v1 = vld [vmem:[#allocation2 + $0x270] sm:$0xff]  ;;  %v50_v2 = vld [vmem:[#allocation2 + $0x88] sm:$0xff]  ;;  %v109_v3 = vld [vmem:[#allocation2 + $0x260] sm:$0xff] }
  0x25   :  { %151 = vmatprep.subr.mxu0 %v46_v22  ;;  %432 = vmatpush3.msra.mxu1 %v62_v50  ;;  %v95_v4 = vld [vmem:[#allocation2 + $0x1f0] sm:$0xff]  ;;  %v108_v5 = vld [vmem:[#allocation2 + $0x258] sm:$0xff]  ;;  %v106_v7 = vld [vmem:[#allocation2 + $0x248] sm:$0xff] }
  0x26   :  { %152 = vmatpush1.msra.mxu0 %v45_v23  ;;  %433 = vmatprep.subr.mxu1 %v107_v52  ;;  %v47_v6 = vld [vmem:[#allocation2 + $0x70] sm:$0xff]  ;;  %v92_v8 = vld [vmem:[#allocation2 + $0x1d8] sm:$0xff]  ;;  %v105_v9 = vld [vmem:[#allocation2 + $0x240] sm:$0xff] }
  0x27   :  { %153 = vmatprep.subr.mxu0 %v43_v25  ;;  %434 = vmatpush3.msra.mxu1 %v59_v54  ;;  %v44_v10 = vld [vmem:[#allocation2 + $0x58] sm:$0xff]  ;;  %v103_v11 = vld [vmem:[#allocation2 + $0x230] sm:$0xff]  ;;  %v89_v12 = vld [vmem:[#allocation2 + $0x1c0] sm:$0xff] }
  0x28   :  { %154 = vmatpush1.msra.mxu0 %v42_v26  ;;  %435 = vmatprep.subr.mxu1 %v104_v56  ;;  %v102_v13 = vld [vmem:[#allocation2 + $0x228] sm:$0xff]  ;;  %v41_v14 = vld [vmem:[#allocation2 + $0x40] sm:$0xff]  ;;  %v100_v15 = vld [vmem:[#allocation2 + $0x218] sm:$0xff] }
  0x29   :  { %155 = vmatprep.subr.mxu0 %v40_v31  ;;  %436 = vmatpush3.msra.mxu1 %v56_v58  ;;  %v86_v16 = vld [vmem:[#allocation2 + $0x1a8] sm:$0xff]  ;;  %v99_v17 = vld [vmem:[#allocation2 + $0x210] sm:$0xff]  ;;  %v97_v19 = vld [vmem:[#allocation2 + $0x200] sm:$0xff] }
  0x2a   :  { %156 = vmatpush1.msra.mxu0 %v39_v33  ;;  %437 = vmatprep.subr.mxu1 %v101_v60  ;;  %v38_v18 = vld [vmem:[#allocation2 + $0x28] sm:$0xff]  ;;  %v83_v20 = vld [vmem:[#allocation2 + $0x190] sm:$0xff]  ;;  %v96_v21 = vld [vmem:[#allocation2 + $0x1f8] sm:$0xff] }
  0x2b   :  { %157 = vmatprep.subr.mxu0 %v37_v35  ;;  %438 = vmatpush3.msra.mxu1 %v53_v62  ;;  %v35_v22 = vld [vmem:[#allocation2 + $0x10] sm:$0xff]  ;;  %v94_v23 = vld [vmem:[#allocation2 + $0x1e8] sm:$0xff]  ;;  %v93_v25 = vld [vmem:[#allocation2 + $0x1e0] sm:$0xff] }
  0x2c   :  { %158 = vmatpush1.msra.mxu0 %v36_v37  ;;  %439 = vmatprep.subr.mxu1 %v98_v0  ;;  %v91_v26 = vld [vmem:[#allocation2 + $0x1d0] sm:$0xff]  ;;  %v314_v27 = vld [vmem:[%s678_s2 + $0x78] sm:$0xff]  ;;  %v90_v28 = vld [vmem:[#allocation2 + $0x1c8] sm:$0xff] }
  0x2d   :  { %159 = vmatprep.subr.mxu0 %v34_v39  ;;  %440 = vmatpush3.msra.mxu1 %v50_v2  ;;  %v29_v29 = vld [vmem:[%s676_s0] sm:$0xff]  ;;  %v88_v30 = vld [vmem:[#allocation2 + $0x1b8] sm:$0xff]  ;;  %v313_v31 = vld [vmem:[%s678_s2 + $0x70] sm:$0xff] }
  0x2e   :  { %160 = vmatpush1.msra.mxu0 %v33_v41  ;;  %441 = vmatprep.subr.mxu1 %v95_v4  ;;  %v87_v32 = vld [vmem:[#allocation2 + $0x1b0] sm:$0xff]  ;;  %v85_v33 = vld [vmem:[#allocation2 + $0x1a0] sm:$0xff]  ;;  %v84_v34 = vld [vmem:[#allocation2 + $0x198] sm:$0xff] }
  0x2f   :  { %161 = vmatprep.subr.mxu0 %v127_v43  ;;  %442 = vmatpush3.msra.mxu1 %v47_v6  ;;  %v82_v35 = vld [vmem:[#allocation2 + $0x188] sm:$0xff]  ;;  %v620_v36 = vld [vmem:[%s676_s0 + $0x18] sm:$0xff]  ;;  %v81_v37 = vld [vmem:[#allocation2 + $0x180] sm:$0xff] }
  0x30   :  { %162 = vmatpush2.msra.mxu0 %v126_v45  ;;  %443 = vmatprep.subr.mxu1 %v92_v8  ;;  %v31_v38 = vld [vmem:[%s676_s0 + $0x10] sm:$0xff]  ;;  %v312_v39 = vld [vmem:[%s678_s2 + $0x68] sm:$0xff]  ;;  %v311_v40 = vld [vmem:[%s678_s2 + $0x60] sm:$0xff] }
  0x31   :  { %163 = vmatprep.subr.mxu0 %v124_v47  ;;  %444 = vmatpush3.msra.mxu1 %v44_v10  ;;  %v310_v41 = vld [vmem:[%s678_s2 + $0x58] sm:$0xff]  ;;  %v309_v42 = vld [vmem:[%s678_s2 + $0x50] sm:$0xff]  ;;  %v308_v43 = vld [vmem:[%s678_s2 + $0x48] sm:$0xff] }
  0x32   :  { %164 = vmatpush2.msra.mxu0 %v123_v49  ;;  %445 = vmatprep.subr.mxu1 %v89_v12  ;;  %v307_v44 = vld [vmem:[%s678_s2 + $0x40] sm:$0xff]  ;;  %v306_v45 = vld [vmem:[%s678_s2 + $0x38] sm:$0xff]  ;;  %v305_v46 = vld [vmem:[%s678_s2 + $0x30] sm:$0xff] }
  0x33   :  { %165 = vmatprep.subr.mxu0 %v121_v51  ;;  %446 = vmatpush3.msra.mxu1 %v41_v14  ;;  %v304_v47 = vld [vmem:[%s678_s2 + $0x28] sm:$0xff]  ;;  %v303_v48 = vld [vmem:[%s678_s2 + $0x20] sm:$0xff]  ;;  %v302_v49 = vld [vmem:[%s678_s2 + $0x18] sm:$0xff] }
  0x34   :  { %166 = vmatpush2.msra.mxu0 %v120_v53  ;;  %447 = vmatprep.subr.mxu1 %v86_v16  ;;  %v301_v50 = vld [vmem:[%s678_s2 + $0x10] sm:$0xff]  ;;  %v300_v51 = vld [vmem:[%s678_s2 + $0x8] sm:$0xff]  ;;  %v299_v52 = vld [vmem:[%s678_s2] sm:$0xff]  ;;  %s575_s2 = smov [#allocation5]  }
  0x35   :  { %167 = vmatprep.subr.mxu0 %v118_v55  ;;  %448 = vmatpush3.msra.mxu1 %v38_v18  ;;  %s407_s29 = sshll.u32 %s575_s2, 4  ;;  %s408_s29 = int_to_ptr.vmem [resolvable:$true] %s407_s29 }
  0x36   :  { %168 = vmatpush2.msra.mxu0 %v117_v57  ;;  %449 = vmatprep.subr.mxu1 %v83_v20  ;;  %s548_s30 = scalar_lea.vmem %s408_s29, 256  ;;  %p553_p6 = scmp.lt.s32.totalorder %s408_s29, %s408_s29 }
  0x37   :  { %169 = vmatprep.subr.mxu0 %v115_v59  ;;  %450 = vmatpush3.msra.mxu1 %v35_v22  ;;  %p549_p5 = scmp.ne.s32.totalorder %s408_s29, %s548_s30  ;;  %p554_p7 = scmp.lt.s32.totalorder %s548_s30, %s548_s30 }
  0x38   :  { %170 = vmatpush2.msra.mxu0 %v114_v61  ;;  %270 = vmatprep.mubr.f32.mxu1 %v604_v24 }
  0x39   :  { %171 = vmatprep.subr.mxu0 %v112_v63  ;;  %271 = vmatmul.mubr.f32.vlgmr.msra.gmra.mxu1 %v29_v29  ;;  %p555_p8 = por %p554_p7, %p553_p6 }
  0x3a   :  { %172 = vmatpush2.msra.mxu0 %v111_v1  ;;  %475 = vmatprep.subr.mxu1 %v314_v27 }
  0x3b   :  { %173 = vmatprep.subr.mxu0 %v109_v3  ;;  %476 = vmatpush3.msra.mxu1 %v314_v27  ;;  %p556_p9 = pnand %p555_p8, %p549_p5 }
  0x3c   :  { %174 = vmatpush2.msra.mxu0 %v108_v5  ;;  %477 = vmatprep.subr.mxu1 %v313_v31 }
  0x3d   :  { %175 = vmatprep.subr.mxu0 %v106_v7  ;;  %478 = vmatpush3.msra.mxu1 %v313_v31 }
  0x3e   :  { %176 = vmatpush2.msra.mxu0 %v105_v9  ;;  %275 = vmatprep.mubr.f32.mxu1 %v620_v36 }
  0x3f   :  { %177 = vmatprep.subr.mxu0 %v103_v11  ;;  %276 = vmatmul.mubr.f32.gmra.mxu1 %v31_v38 }
  0x40   :  { %178 = vmatpush2.msra.mxu0 %v102_v13  ;;  %479 = vmatprep.subr.mxu1 %v312_v39 }
  0x41   :  { %179 = vmatprep.subr.mxu0 %v100_v15  ;;  %480 = vmatpush3.msra.mxu1 %v312_v39 }
  0x42   :  { %180 = vmatpush2.msra.mxu0 %v99_v17  ;;  %481 = vmatprep.subr.mxu1 %v311_v40 }
  0x43   :  { %181 = vmatprep.subr.mxu0 %v97_v19  ;;  %482 = vmatpush3.msra.mxu1 %v311_v40 }
  0x44   :  { %182 = vmatpush2.msra.mxu0 %v96_v21  ;;  %483 = vmatprep.subr.mxu1 %v310_v41 }
  0x45   :  { %183 = vmatprep.subr.mxu0 %v94_v23  ;;  %484 = vmatpush3.msra.mxu1 %v310_v41 }
  0x46   :  { %184 = vmatpush2.msra.mxu0 %v93_v25  ;;  %485 = vmatprep.subr.mxu1 %v309_v42 }
  0x47   :  { %185 = vmatprep.subr.mxu0 %v91_v26  ;;  %486 = vmatpush3.msra.mxu1 %v309_v42 }
  0x48   :  { %186 = vmatpush2.msra.mxu0 %v90_v28  ;;  %487 = vmatprep.subr.mxu1 %v308_v43 }
  0x49   :  { %187 = vmatprep.subr.mxu0 %v88_v30  ;;  %488 = vmatpush3.msra.mxu1 %v308_v43 }
  0x4a   :  { %188 = vmatpush2.msra.mxu0 %v87_v32  ;;  %489 = vmatprep.subr.mxu1 %v307_v44 }
  0x4b   :  { %189 = vmatprep.subr.mxu0 %v85_v33  ;;  %490 = vmatpush3.msra.mxu1 %v307_v44 }
  0x4c   :  { %190 = vmatpush2.msra.mxu0 %v84_v34  ;;  %491 = vmatprep.subr.mxu1 %v306_v45 }
  0x4d   :  { %191 = vmatprep.subr.mxu0 %v82_v35  ;;  %492 = vmatpush3.msra.mxu1 %v306_v45 }
  0x4e   :  { %192 = vmatpush2.msra.mxu0 %v81_v37  ;;  %493 = vmatprep.subr.mxu1 %v305_v46 }
  0x4f   :  { %194 = vmatmul.mubr.f32.vlgmr.msra.gmra.mxu0 %v29_v29  ;;  %494 = vmatpush3.msra.mxu1 %v305_v46 }
  0x50   :  { %199 = vmatprep.mubr.f32.mxu0 %v620_v36  ;;  %495 = vmatprep.subr.mxu1 %v304_v47 }
  0x51   :  { %496 = vmatpush3.msra.mxu1 %v304_v47 }
  0x52   :  { %497 = vmatprep.subr.mxu1 %v303_v48 }
  0x53   :  { %200 = vmatmul.mubr.f32.gmra.mxu0 %v31_v38  ;;  %498 = vmatpush3.msra.mxu1 %v303_v48 }
  0x54   :  { %499 = vmatprep.subr.mxu1 %v302_v49 }
  0x55   :  { %500 = vmatpush3.msra.mxu1 %v302_v49 }
  0x56   :  { %501 = vmatprep.subr.mxu1 %v301_v50 }
  0x57   :  { %502 = vmatpush3.msra.mxu1 %v301_v50 }
  0x58   :  { %503 = vmatprep.subr.mxu1 %v300_v51 }
  0x59   :  { %504 = vmatpush3.msra.mxu1 %v300_v51 }
  0x5a   :  { %505 = vmatprep.subr.mxu1 %v299_v52 }
  0x5b   :  { %506 = vmatpush3.msra.mxu1 %v299_v52 }
  0xf9   :  { %v451_v3 = vpop.f32.mrf.mxu1 }
  0xfb   :  { %v452_v4 = vpop.f32.mrf.mxu1 }
  0xfc   :  { %v453_v11 = vadd.f32 %v452_v4, %v451_v3 }
  0xff   :  { %v454_v5 = vpop.f32.mrf.mxu1 }
 0x101   :  { %v455_v8 = vpop.f32.mrf.mxu1 }
 0x102   :  { %v456_v9 = vadd.f32 %v455_v8, %v454_v5 }
 0x10f   :  { %v195_v53 = vpop.f32.mrf.mxu0 }
 0x110   :  { %v281_v7 = vmul.f32 0.5, %v195_v53 }
 0x111   :  { %v197_v54 = vpop.f32.mrf.mxu0 }
 0x112   :  { %v289_v55 = vmul.f32 0.5, %v197_v54 }
 0x113   :  { %v201_v56 = vpop.f32.mrf.mxu0 }
 0x114   :  { %516 = vtanh.f32 %v289_v55  ;;  %v282_v6 = vmul.f32 0.5, %v201_v56 }
 0x115   :  { %v203_v57 = vpop.f32.mrf.mxu0 }
 0x116   :  { %v290_v58 = vmul.f32 0.5, %v203_v57 }
 0x118   :  { %518 = vtanh.f32 %v290_v58 }
 0x119   :  { %520 = vtanh.f32 %v282_v6 }
 0x11a   :  { %522 = vtanh.f32 %v281_v7 }
 0x121   :  { %v517_v59 = vpop.eup %516 }
 0x122   :  { %v293_v60 = vmul.f32 0.5, %v517_v59 }
 0x124   :  { %v295_v61 = vadd.f32 0.5, %v293_v60 }
 0x125   :  { %v519_v62 = vpop.eup %518 }
 0x126   :  { %v294_v63 = vmul.f32 0.5, %v519_v62  ;;  %v297_v0 = vmul.f32 %v295_v61, %v604_v24  ;;  %v521_v15 = vpop.eup %520 }
 0x127   :  { %v523_v16 = vpop.eup %522  ;;  %v286_v17 = vmul.f32 0.5, %v521_v15 }
 0x128   :  { %v296_v1 = vadd.f32 0.5, %v294_v63  ;;  %507 = vmatprep.mubr.f32.mxu1 %v297_v0  ;;  %v285_v18 = vmul.f32 0.5, %v523_v16 }
 0x129   :  { %v288_v20 = vadd.f32 0.5, %v286_v17 }
 0x12a   :  { %v298_v2 = vmul.f32 %v296_v1, %v620_v36  ;;  %v287_v23 = vadd.f32 0.5, %v285_v18 }
 0x12c   :  { %508 = vmatmul.mubr.f32.vlgmr.msra.gmra.mxu1 %v298_v2 }
 0x1ec   :  { %v509_v10 = vpop.f32.mrf.mxu1 }
 0x1ed   :  { %v391_v12 = vadd.f32 %v509_v10, %v456_v9 }
 0x1ee   :  { %v381_v13 = vpop.f32.mrf.mxu1 }
 0x1ef   :  { %524 = vtanh.f32 %v391_v12  ;;  %v390_v14 = vadd.f32 %v453_v11, %v381_v13 }
 0x1f1   :  { %526 = vtanh.f32 %v390_v14 }
 0x1fc   :  { %v525_v19 = vpop.eup %524 }
 0x1fd   :  { %v395_v21 = vsub.f32 %v620_v36, %v525_v19 }
 0x1fe   :  { %v527_v22 = vpop.eup %526 }
 0x1ff   :  { %v394_v25 = vsub.f32 %v604_v24, %v527_v22  ;;  %v397_v26 = vmul.f32 %v395_v21, %v288_v20 }
 0x201   :  { %v396_v27 = vmul.f32 %v394_v25, %v287_v23  ;;  %v399_v28 = vadd.f32 %v525_v19, %v397_v26 }
 0x203   :  { %v398_v29 = vadd.f32 %v527_v22, %v396_v27  ;;  %401 = vst [vmem:[#allocation5 + $0x8] sm:$0xff] %v399_v28 }
 0x205   :  { %400 = vst [vmem:[#allocation5] sm:$0xff] %v398_v29 }
 0x206   :  { %559 = shalt.err (!%p556_p9)
}
 0x207   :  { %s576_s4 = smov 128   ;;  %s577_s5 = smov 8  }
 0x208   :  { %413 = dma.vmem_to_hbm [thread:$0]  %s408_s29, 256, %s679_s3, [#allocation4], %s576_s4, %s576_s4, %s577_s5  }
 0x209   :  { %570 = dma.done.wait [#allocation4], 256  }
 0x20a   :  { %571 = vsyncadd [#allocation4], 4294967040 }
 0x20b   :  { %417 = vsyncpa [#allocation3], 1 }
 0x20c   :  { %418 = vsyncpa [#allocation4], 1 }

</bundles_post_ra>
